<compile_context>
chip_gen: v5e
topology: v5e:2x2
jax: 0.10.0
libtpu: 0.0.40
codegen_flags: <defaults>
</compile_context>

<pallas_src>
import functools

import jax
import jax.numpy as jnp
from jax.experimental import pallas as pl
from jax.experimental.pallas import tpu as pltpu


# ----------------------------------------------------------------------------
# Kernel
# ----------------------------------------------------------------------------
def gate_kernel(text_ref, rc_ref, rs_ref, wc_ref, ws_ref,
                w_text_ref, w_comet_ref, w_sbert_ref, b_ref,
                out_r_ref, out_w_ref, *, compute_dtype):
    cd = compute_dtype
    exact = jnp.dtype(cd) == jnp.dtype(jnp.float32)

    w_t = w_text_ref[...]
    w_c = w_comet_ref[...]
    w_s = w_sbert_ref[...]
    b = b_ref[...].astype(jnp.float32)

    # Shared text projection; bias folded in exactly once (used by both gates).
    z_text = jnp.dot(text_ref[...].astype(cd), w_t,
                     preferred_element_type=jnp.float32) + b

    def gate_prob(z):
        # Probability of class 0 of softmax(z), shape (TM, 1), f32.
        # max-subtraction also keeps padded edge-tile rows finite.
        m = jnp.max(z, axis=-1, keepdims=True)
        denom = jnp.sum(jnp.exp(z - m), axis=-1, keepdims=True)
        num = jnp.exp(z[:, 0:1] - m)
        if exact:
            return num / denom                                 # exact f32 path
        return num * pl.reciprocal(denom, approx=True)         # EUP slot

    # ---- React branch first (short live ranges: rc/rs/zr die before wc/ws) --
    rc = rc_ref[...]
    rs = rs_ref[...]
    zr = (z_text
          + jnp.dot(rc.astype(cd), w_c, preferred_element_type=jnp.float32)
          + jnp.dot(rs.astype(cd), w_s, preferred_element_type=jnp.float32))
    gr = gate_prob(zr)
    rc_f = rc.astype(jnp.float32)
    rs_f = rs.astype(jnp.float32)
    # out = rs + g*(rc - rs)  ==  g*rc + (1-g)*rs, one fewer full-tile multiply.
    out_r_ref[...] = (rs_f + gr * (rc_f - rs_f)).astype(out_r_ref.dtype)

    # ---- Want branch --------------------------------------------------------
    wc = wc_ref[...]
    ws = ws_ref[...]
    zw = (z_text
          + jnp.dot(wc.astype(cd), w_c, preferred_element_type=jnp.float32)
          + jnp.dot(ws.astype(cd), w_s, preferred_element_type=jnp.float32))
    gw = gate_prob(zw)
    wc_f = wc.astype(jnp.float32)
    ws_f = ws.astype(jnp.float32)
    out_w_ref[...] = (ws_f + gw * (wc_f - ws_f)).astype(out_w_ref.dtype)


# ----------------------------------------------------------------------------
# Wrapper
# ----------------------------------------------------------------------------
def _round_up(x, m):
    return ((x + m - 1) // m) * m


def _vmem_capacity_bytes():
    try:
        return int(pltpu.get_tpu_info().vmem_capacity_bytes)
    except Exception:
        return 64 * 1024 * 1024        # conservative (v7x per-TC VMEM)


def _select_tm(M, D, in_isz, out_isz, w_isz, vmem_cap, tm):
    # Row multiple of 16: bf16 packs 2 rows per sublane (also fine for f32).
    mult = 16
    big_vmem = vmem_cap >= 100 * (1 << 20)          # v5e / v6e (128 MiB)
    if tm is None:
        tm = 1024 if big_vmem else 512
        # Guarantee >= 2 grid steps so ("parallel",) feeds both v7x TCs;
        # the extra ~0.35 us step is negligible on single-TC chips here.
        if M >= 4 * mult:
            tm = min(tm, _round_up(pl.cdiv(M, 2), mult))
    tm = min(tm, M)
    if tm != M:
        tm = max(mult, (tm // mult) * mult)

    def need(t):
        # 5 input + 2 output streams double-buffered, weights (assume 2 bufs),
        # bias, plus an allowance for compiler temps (z_text/zr/exp/f32 casts).
        return (2 * 5 * t * D * in_isz
                + 2 * 2 * t * D * out_isz
                + 2 * 3 * D * D * w_isz + 2 * D * 4
                + 4 * t * D * 4)

    while tm > 2 * mult and need(tm) > int(0.55 * vmem_cap):
        tm = max(mult, ((tm // 2) // mult) * mult)
    return tm, need(tm)


def gate_module_forward(text_emb, xReact_comet, xWant_comet,
                        xReact_sbert, xWant_sbert, weight, bias,
                        *, compute_dtype=jnp.bfloat16, out_dtype=None, tm=None):
    """weight: (D, 3D) torch-style (out, in); bias: (D,).

    Activations are streamed at their own dtype (feed bf16 from the upstream
    producer on v6e/v7x — the kernel is HBM-bound at f32 I/O); outputs default
    to the activation dtype.  Gate/blend math runs in f32 inside the kernel.
    """
    B, S, D = text_emb.shape
    M = B * S
    flat = lambda x: x.reshape(M, D)
    if out_dtype is None:
        out_dtype = text_emb.dtype

    # Pre-transpose / split the torch Linear weight into its three column
    # groups (text / comet / sbert) so the kernel never concatenates along the
    # lane axis; cast weights once to the MXU compute dtype.
    # (D=768 is a multiple of 256; pad these blocks if a non-aligned D is used.)
    w_t = weight[:, :D].T.astype(compute_dtype)
    w_c = weight[:, D:2 * D].T.astype(compute_dtype)
    w_s = weight[:, 2 * D:].T.astype(compute_dtype)
    b2 = bias.reshape(1, D).astype(jnp.float32)

    in_isz = jnp.dtype(text_emb.dtype).itemsize
    out_isz = jnp.dtype(out_dtype).itemsize
    w_isz = jnp.dtype(compute_dtype).itemsize
    vmem_cap = _vmem_capacity_bytes()

    tm, need = _select_tm(M, D, in_isz, out_isz, w_isz, vmem_cap, tm)
    grid = (pl.cdiv(M, tm),)

    # VMEM hint: footprint + margin, capped well below physical VMEM so
    # compiler-internal temps never overrun (esp. on 64 MiB v7x).
    vmem_limit = int(min(int(0.8 * vmem_cap),
                         max(32 * 1024 * 1024, need + (4 << 20))))

    cost = pl.CostEstimate(
        flops=10 * M * D * D,                        # 5 shared-K (D,D) matmuls
        transcendentals=2 * M * (D + 2),             # exp tiles + exp/recip col
        bytes_accessed=(5 * M * D * in_isz + 2 * M * D * out_isz
                        + 3 * D * D * w_isz + D * 4))

    kernel = functools.partial(gate_kernel, compute_dtype=compute_dtype)
    act_spec = pl.BlockSpec((tm, D), lambda i: (i, 0))
    b_spec = pl.BlockSpec((1, D), lambda i: (0, 0))

    def _call(single_buffer_weights):
        if single_buffer_weights:
            # Constant index_map -> second buffer is dead weight; keep one.
            w_spec = pl.BlockSpec((D, D), lambda i: (0, 0),
                                  pipeline_mode=pl.Buffered(1))
        else:
            w_spec = pl.BlockSpec((D, D), lambda i: (0, 0))
        res = pl.pallas_call(
            kernel,
            out_shape=(jax.ShapeDtypeStruct((M, D), out_dtype),
                       jax.ShapeDtypeStruct((M, D), out_dtype)),
            grid=grid,
            in_specs=[act_spec, act_spec, act_spec, act_spec, act_spec,
                      w_spec, w_spec, w_spec, b_spec],
            out_specs=(act_spec, act_spec),
            compiler_params=pltpu.CompilerParams(
                dimension_semantics=("parallel",),
                vmem_limit_bytes=vmem_limit),
            cost_estimate=cost,
        )(flat(text_emb), flat(xReact_comet), flat(xReact_sbert),
          flat(xWant_comet), flat(xWant_sbert), w_t, w_c, w_s, b2)
        return jax.block_until_ready(res)

    try:
        out_r, out_w = _call(True)
    except Exception:
        # Fallback for Pallas versions that reject 1-deep pipeline_mode.
        out_r, out_w = _call(False)

    return out_r.reshape(B, S, D), out_w.reshape(B, S, D)


# ----------------------------------------------------------------------------
# Pure-JAX reference (mirror of the PyTorch GateModule.forward)
# ----------------------------------------------------------------------------
def reference_forward(text_emb, xReact_comet, xWant_comet,
                      xReact_sbert, xWant_sbert, weight, bias):
    xr = jnp.concatenate((text_emb, xReact_comet, xReact_sbert), -1)
    xw = jnp.concatenate((text_emb, xWant_comet, xWant_sbert), -1)
    zr = xr.astype(jnp.float32) @ weight.T + bias
    zw = xw.astype(jnp.float32) @ weight.T + bias
    gr = jax.nn.softmax(zr, axis=-1)[:, :, 0:1]
    gw = jax.nn.softmax(zw, axis=-1)[:, :, 0:1]
    out_r = gr * xReact_comet + (1 - gr) * xReact_sbert
    out_w = gw * xWant_comet + (1 - gw) * xWant_sbert
    return out_r.astype(jnp.float32), out_w.astype(jnp.float32)


def _make_inputs(B, S, D, key, act_dtype=jnp.float32):
    keys = jax.random.split(key, 7)
    mk = lambda k: jax.random.normal(k, (B, S, D), jnp.float32).astype(act_dtype)
    text_emb = mk(keys[0])
    xReact_comet = mk(keys[1])
    xWant_comet = mk(keys[2])
    xReact_sbert = mk(keys[3])
    xWant_sbert = mk(keys[4])
    # nn.Linear(3D, D): weight (D, 3D), bias (D,) — deterministic init.
    bound = 1.0 / jnp.sqrt(3.0 * D)
    weight = jax.random.uniform(keys[5], (D, 3 * D), jnp.float32, -bound, bound)
    bias = jax.random.uniform(keys[6], (D,), jnp.float32, -bound, bound)
    return (text_emb, xReact_comet, xWant_comet, xReact_sbert, xWant_sbert,
            weight, bias)


def _check(out_r, out_w, ref_r, ref_w, atol, rtol):
    out_r = out_r.astype(jnp.float32)
    out_w = out_w.astype(jnp.float32)
    assert jnp.allclose(out_r, ref_r, atol=atol, rtol=rtol)
    assert jnp.allclose(out_w, ref_w, atol=atol, rtol=rtol)


if __name__ == "__main__":
    # Test 1: small shapes, f32 compute path (exact divide) — tight tolerance.
    args = _make_inputs(2, 8, 32, jax.random.PRNGKey(0))
    out_r, out_w = gate_module_forward(*args, compute_dtype=jnp.float32)
    jax.block_until_ready((out_r, out_w))
    ref_r, ref_w = reference_forward(*args)
    _check(out_r, out_w, ref_r, ref_w, atol=2e-5, rtol=2e-5)

    # Test 2: small shapes, bf16 I/O + bf16 MXU path (relaxed tolerance).
    args_bf = _make_inputs(2, 8, 32, jax.random.PRNGKey(0), act_dtype=jnp.bfloat16)
    out_r2, out_w2 = gate_module_forward(*args_bf)
    jax.block_until_ready((out_r2, out_w2))
    ref_r2, ref_w2 = reference_forward(*args_bf)
    _check(out_r2, out_w2, ref_r2, ref_w2, atol=4e-2, rtol=4e-2)

    # Test 3: M not divisible by the row tile (exercises padded edge block).
    args3 = _make_inputs(2, 72, 32, jax.random.PRNGKey(1))      # M=144, tm=64
    out_r3, out_w3 = gate_module_forward(*args3, tm=64)
    jax.block_until_ready((out_r3, out_w3))
    ref_r3, ref_w3 = reference_forward(*args3)
    _check(out_r3, out_w3, ref_r3, ref_w3, atol=3e-2, rtol=3e-2)

    # Test 4: production-like shape (BERT hidden size) with bf16 activations —
    # exercises the real (8,128)-tiled layout, TM selection and VMEM-limit math.
    args4 = _make_inputs(8, 512, 768, jax.random.PRNGKey(2), act_dtype=jnp.bfloat16)
    out_r4, out_w4 = gate_module_forward(*args4)
    jax.block_until_ready((out_r4, out_w4))
    ref_r4, ref_w4 = reference_forward(*args4)
    _check(out_r4, out_w4, ref_r4, ref_w4, atol=5e-2, rtol=5e-2)

    print("KERNEL_OK")
</pallas_src>

<mosaic_0001>
module attributes {stable_mosaic.version = 11 : i64} {
  func.func @gate_kernel(%arg0: i32, %arg1: memref<16x32xf32, #tpu.memory_space<vmem>>, %arg2: memref<16x32xf32, #tpu.memory_space<vmem>>, %arg3: memref<16x32xf32, #tpu.memory_space<vmem>>, %arg4: memref<16x32xf32, #tpu.memory_space<vmem>>, %arg5: memref<16x32xf32, #tpu.memory_space<vmem>>, %arg6: memref<32x32xf32, #tpu.memory_space<vmem>>, %arg7: memref<32x32xf32, #tpu.memory_space<vmem>>, %arg8: memref<32x32xf32, #tpu.memory_space<vmem>>, %arg9: memref<1x32xf32, #tpu.memory_space<vmem>>, %arg10: memref<16x32xf32, #tpu.memory_space<vmem>>, %arg11: memref<16x32xf32, #tpu.memory_space<vmem>>) attributes {dimension_semantics = [#tpu.dimension_semantics<parallel>], iteration_bounds = array<i64: 1>, scalar_prefetch = 0 : i64, scratch_operands = 0 : i64, tpu.core_type = #tpu.core_type<tc>, window_params = [{transform_indices = @transform_0, window_bounds = array<i64: 16, 32>}, {transform_indices = @transform_1, window_bounds = array<i64: 16, 32>}, {transform_indices = @transform_2, window_bounds = array<i64: 16, 32>}, {transform_indices = @transform_3, window_bounds = array<i64: 16, 32>}, {transform_indices = @transform_4, window_bounds = array<i64: 16, 32>}, {pipeline_mode = #tpu.pipeline_mode<synchronous>, transform_indices = @transform_5, window_bounds = array<i64: 32, 32>}, {pipeline_mode = #tpu.pipeline_mode<synchronous>, transform_indices = @transform_6, window_bounds = array<i64: 32, 32>}, {pipeline_mode = #tpu.pipeline_mode<synchronous>, transform_indices = @transform_7, window_bounds = array<i64: 32, 32>}, {pipeline_mode = #tpu.pipeline_mode<synchronous>, transform_indices = @transform_8, window_bounds = array<i64: 1, 32>}, {transform_indices = @transform_9, window_bounds = array<i64: 16, 32>}, {transform_indices = @transform_10, window_bounds = array<i64: 16, 32>}]} {
    %c0 = arith.constant 0 : index
    %c0_0 = arith.constant 0 : index
    %0 = vector.load %arg6[%c0, %c0_0] : memref<32x32xf32, #tpu.memory_space<vmem>>, vector<32x32xf32>
    %c0_1 = arith.constant 0 : index
    %c0_2 = arith.constant 0 : index
    %1 = vector.load %arg7[%c0_1, %c0_2] : memref<32x32xf32, #tpu.memory_space<vmem>>, vector<32x32xf32>
    %c0_3 = arith.constant 0 : index
    %c0_4 = arith.constant 0 : index
    %2 = vector.load %arg8[%c0_3, %c0_4] : memref<32x32xf32, #tpu.memory_space<vmem>>, vector<32x32xf32>
    %c0_5 = arith.constant 0 : index
    %c0_6 = arith.constant 0 : index
    %3 = vector.load %arg9[%c0_5, %c0_6] : memref<1x32xf32, #tpu.memory_space<vmem>>, vector<1x32xf32>
    %c0_7 = arith.constant 0 : index
    %c0_8 = arith.constant 0 : index
    %4 = vector.load %arg1[%c0_7, %c0_8] : memref<16x32xf32, #tpu.memory_space<vmem>>, vector<16x32xf32>
    %cst = arith.constant dense<0.000000e+00> : vector<16x32xf32>
    %5 = tpu.matmul %4, %0, %cst {dimension_numbers = #tpu.dot_dimension_numbers<[1], [0], [0], [1], [0, 0, 1, 1], [], []>} : vector<16x32xf32>, vector<32x32xf32>, vector<16x32xf32> -> vector<16x32xf32>
    %6 = vector.broadcast %3 : vector<1x32xf32> to vector<16x32xf32>
    %7 = arith.addf %5, %6 : vector<16x32xf32>
    %c0_9 = arith.constant 0 : index
    %c0_10 = arith.constant 0 : index
    %8 = vector.load %arg2[%c0_9, %c0_10] : memref<16x32xf32, #tpu.memory_space<vmem>>, vector<16x32xf32>
    %c0_11 = arith.constant 0 : index
    %c0_12 = arith.constant 0 : index
    %9 = vector.load %arg3[%c0_11, %c0_12] : memref<16x32xf32, #tpu.memory_space<vmem>>, vector<16x32xf32>
    %cst_13 = arith.constant dense<0.000000e+00> : vector<16x32xf32>
    %10 = tpu.matmul %8, %1, %cst_13 {dimension_numbers = #tpu.dot_dimension_numbers<[1], [0], [0], [1], [0, 0, 1, 1], [], []>} : vector<16x32xf32>, vector<32x32xf32>, vector<16x32xf32> -> vector<16x32xf32>
    %11 = arith.addf %7, %10 : vector<16x32xf32>
    %cst_14 = arith.constant dense<0.000000e+00> : vector<16x32xf32>
    %12 = tpu.matmul %9, %2, %cst_14 {dimension_numbers = #tpu.dot_dimension_numbers<[1], [0], [0], [1], [0, 0, 1, 1], [], []>} : vector<16x32xf32>, vector<32x32xf32>, vector<16x32xf32> -> vector<16x32xf32>
    %13 = arith.addf %11, %12 : vector<16x32xf32>
    %cst_15 = arith.constant dense<0xFF800000> : vector<16xf32>
    %14 = vector.multi_reduction <maximumf>, %13, %cst_15 [1] : vector<16x32xf32> to vector<16xf32>
    %15 = vector.shape_cast %14 : vector<16xf32> to vector<16x1xf32>
    %16 = vector.broadcast %15 : vector<16x1xf32> to vector<16x32xf32>
    %17 = arith.subf %13, %16 : vector<16x32xf32>
    %18 = math.exp %17 : vector<16x32xf32>
    %cst_16 = arith.constant dense<0.000000e+00> : vector<16xf32>
    %19 = vector.multi_reduction <add>, %18, %cst_16 [1] : vector<16x32xf32> to vector<16xf32>
    %20 = vector.shape_cast %19 : vector<16xf32> to vector<16x1xf32>
    %21 = vector.extract_strided_slice %13 {offsets = [0, 0], sizes = [16, 1], strides = [1, 1]} : vector<16x32xf32> to vector<16x1xf32>
    %22 = arith.subf %21, %15 : vector<16x1xf32>
    %23 = math.exp %22 : vector<16x1xf32>
    %24 = arith.divf %23, %20 : vector<16x1xf32>
    %25 = arith.subf %8, %9 : vector<16x32xf32>
    %26 = vector.broadcast %24 : vector<16x1xf32> to vector<16x32xf32>
    %27 = arith.mulf %26, %25 : vector<16x32xf32>
    %28 = arith.addf %9, %27 : vector<16x32xf32>
    %c0_17 = arith.constant 0 : index
    %c0_18 = arith.constant 0 : index
    %29 = vector.load %arg10[%c0_17, %c0_18] : memref<16x32xf32, #tpu.memory_space<vmem>>, vector<16x32xf32>
    tpu.vector_store %arg10[%c0_17, %c0_18], %28 {strides = array<i32>} : memref<16x32xf32, #tpu.memory_space<vmem>>, vector<16x32xf32>,
    %c0_19 = arith.constant 0 : index
    %c0_20 = arith.constant 0 : index
    %30 = vector.load %arg4[%c0_19, %c0_20] : memref<16x32xf32, #tpu.memory_space<vmem>>, vector<16x32xf32>
    %c0_21 = arith.constant 0 : index
    %c0_22 = arith.constant 0 : index
    %31 = vector.load %arg5[%c0_21, %c0_22] : memref<16x32xf32, #tpu.memory_space<vmem>>, vector<16x32xf32>
    %cst_23 = arith.constant dense<0.000000e+00> : vector<16x32xf32>
    %32 = tpu.matmul %30, %1, %cst_23 {dimension_numbers = #tpu.dot_dimension_numbers<[1], [0], [0], [1], [0, 0, 1, 1], [], []>} : vector<16x32xf32>, vector<32x32xf32>, vector<16x32xf32> -> vector<16x32xf32>
    %33 = arith.addf %7, %32 : vector<16x32xf32>
    %cst_24 = arith.constant dense<0.000000e+00> : vector<16x32xf32>
    %34 = tpu.matmul %31, %2, %cst_24 {dimension_numbers = #tpu.dot_dimension_numbers<[1], [0], [0], [1], [0, 0, 1, 1], [], []>} : vector<16x32xf32>, vector<32x32xf32>, vector<16x32xf32> -> vector<16x32xf32>
    %35 = arith.addf %33, %34 : vector<16x32xf32>
    %cst_25 = arith.constant dense<0xFF800000> : vector<16xf32>
    %36 = vector.multi_reduction <maximumf>, %35, %cst_25 [1] : vector<16x32xf32> to vector<16xf32>
    %37 = vector.shape_cast %36 : vector<16xf32> to vector<16x1xf32>
    %38 = vector.broadcast %37 : vector<16x1xf32> to vector<16x32xf32>
    %39 = arith.subf %35, %38 : vector<16x32xf32>
    %40 = math.exp %39 : vector<16x32xf32>
    %cst_26 = arith.constant dense<0.000000e+00> : vector<16xf32>
    %41 = vector.multi_reduction <add>, %40, %cst_26 [1] : vector<16x32xf32> to vector<16xf32>
    %42 = vector.shape_cast %41 : vector<16xf32> to vector<16x1xf32>
    %43 = vector.extract_strided_slice %35 {offsets = [0, 0], sizes = [16, 1], strides = [1, 1]} : vector<16x32xf32> to vector<16x1xf32>
    %44 = arith.subf %43, %37 : vector<16x1xf32>
    %45 = math.exp %44 : vector<16x1xf32>
    %46 = arith.divf %45, %42 : vector<16x1xf32>
    %47 = arith.subf %30, %31 : vector<16x32xf32>
    %48 = vector.broadcast %46 : vector<16x1xf32> to vector<16x32xf32>
    %49 = arith.mulf %48, %47 : vector<16x32xf32>
    %50 = arith.addf %31, %49 : vector<16x32xf32>
    %c0_27 = arith.constant 0 : index
    %c0_28 = arith.constant 0 : index
    %51 = vector.load %arg11[%c0_27, %c0_28] : memref<16x32xf32, #tpu.memory_space<vmem>>, vector<16x32xf32>
    tpu.vector_store %arg11[%c0_27, %c0_28], %50 {strides = array<i32>} : memref<16x32xf32, #tpu.memory_space<vmem>>, vector<16x32xf32>,
    return
  }
  func.func @transform_0(%arg0: i32) -> (i32, i32) {
    %c0_i32 = arith.constant 0 : i32
    %c0_i32_0 = arith.constant 0 : i32
    return %arg0, %c0_i32 : i32, i32
  }
  func.func @transform_1(%arg0: i32) -> (i32, i32) {
    %c0_i32 = arith.constant 0 : i32
    %c0_i32_0 = arith.constant 0 : i32
    return %arg0, %c0_i32 : i32, i32
  }
  func.func @transform_2(%arg0: i32) -> (i32, i32) {
    %c0_i32 = arith.constant 0 : i32
    %c0_i32_0 = arith.constant 0 : i32
    return %arg0, %c0_i32 : i32, i32
  }
  func.func @transform_3(%arg0: i32) -> (i32, i32) {
    %c0_i32 = arith.constant 0 : i32
    %c0_i32_0 = arith.constant 0 : i32
    return %arg0, %c0_i32 : i32, i32
  }
  func.func @transform_4(%arg0: i32) -> (i32, i32) {
    %c0_i32 = arith.constant 0 : i32
    %c0_i32_0 = arith.constant 0 : i32
    return %arg0, %c0_i32 : i32, i32
  }
  func.func @transform_5(%arg0: i32) -> (i32, i32) {
    %c0_i32 = arith.constant 0 : i32
    %c0_i32_0 = arith.constant 0 : i32
    %c0_i32_1 = arith.constant 0 : i32
    return %c0_i32, %c0_i32_0 : i32, i32
  }
  func.func @transform_6(%arg0: i32) -> (i32, i32) {
    %c0_i32 = arith.constant 0 : i32
    %c0_i32_0 = arith.constant 0 : i32
    %c0_i32_1 = arith.constant 0 : i32
    return %c0_i32, %c0_i32_0 : i32, i32
  }
  func.func @transform_7(%arg0: i32) -> (i32, i32) {
    %c0_i32 = arith.constant 0 : i32
    %c0_i32_0 = arith.constant 0 : i32
    %c0_i32_1 = arith.constant 0 : i32
    return %c0_i32, %c0_i32_0 : i32, i32
  }
  func.func @transform_8(%arg0: i32) -> (i32, i32) {
    %c0_i32 = arith.constant 0 : i32
    %c0_i32_0 = arith.constant 0 : i32
    %c0_i32_1 = arith.constant 0 : i32
    return %c0_i32, %c0_i32_0 : i32, i32
  }
  func.func @transform_9(%arg0: i32) -> (i32, i32) {
    %c0_i32 = arith.constant 0 : i32
    %c0_i32_0 = arith.constant 0 : i32
    return %arg0, %c0_i32 : i32, i32
  }
  func.func @transform_10(%arg0: i32) -> (i32, i32) {
    %c0_i32 = arith.constant 0 : i32
    %c0_i32_0 = arith.constant 0 : i32
    return %arg0, %c0_i32 : i32, i32
  }
}

module attributes {stable_mosaic.version = 11 : i64} {
  func.func @gate_kernel(%arg0: i32, %arg1: memref<16x32xf32, #tpu.memory_space<vmem>>, %arg2: memref<16x32xf32, #tpu.memory_space<vmem>>, %arg3: memref<16x32xf32, #tpu.memory_space<vmem>>, %arg4: memref<16x32xf32, #tpu.memory_space<vmem>>, %arg5: memref<16x32xf32, #tpu.memory_space<vmem>>, %arg6: memref<32x32xf32, #tpu.memory_space<vmem>>, %arg7: memref<32x32xf32, #tpu.memory_space<vmem>>, %arg8: memref<32x32xf32, #tpu.memory_space<vmem>>, %arg9: memref<1x32xf32, #tpu.memory_space<vmem>>, %arg10: memref<16x32xf32, #tpu.memory_space<vmem>>, %arg11: memref<16x32xf32, #tpu.memory_space<vmem>>) attributes {dimension_semantics = [#tpu.dimension_semantics<parallel>], iteration_bounds = array<i64: 1>, scalar_prefetch = 0 : i64, scratch_operands = 0 : i64, tpu.core_type = #tpu.core_type<tc>, window_params = [{transform_indices = @transform_0, window_bounds = array<i64: 16, 32>}, {transform_indices = @transform_1, window_bounds = array<i64: 16, 32>}, {transform_indices = @transform_2, window_bounds = array<i64: 16, 32>}, {transform_indices = @transform_3, window_bounds = array<i64: 16, 32>}, {transform_indices = @transform_4, window_bounds = array<i64: 16, 32>}, {pipeline_mode = #tpu.pipeline_mode<synchronous>, transform_indices = @transform_5, window_bounds = array<i64: 32, 32>}, {pipeline_mode = #tpu.pipeline_mode<synchronous>, transform_indices = @transform_6, window_bounds = array<i64: 32, 32>}, {pipeline_mode = #tpu.pipeline_mode<synchronous>, transform_indices = @transform_7, window_bounds = array<i64: 32, 32>}, {pipeline_mode = #tpu.pipeline_mode<synchronous>, transform_indices = @transform_8, window_bounds = array<i64: 1, 32>}, {transform_indices = @transform_9, window_bounds = array<i64: 16, 32>}, {transform_indices = @transform_10, window_bounds = array<i64: 16, 32>}]} {
    %c0 = arith.constant 0 : index
    %c0_0 = arith.constant 0 : index
    %0 = vector.load %arg6[%c0, %c0_0] : memref<32x32xf32, #tpu.memory_space<vmem>>, vector<32x32xf32>
    %c0_1 = arith.constant 0 : index
    %c0_2 = arith.constant 0 : index
    %1 = vector.load %arg7[%c0_1, %c0_2] : memref<32x32xf32, #tpu.memory_space<vmem>>, vector<32x32xf32>
    %c0_3 = arith.constant 0 : index
    %c0_4 = arith.constant 0 : index
    %2 = vector.load %arg8[%c0_3, %c0_4] : memref<32x32xf32, #tpu.memory_space<vmem>>, vector<32x32xf32>
    %c0_5 = arith.constant 0 : index
    %c0_6 = arith.constant 0 : index
    %3 = vector.load %arg9[%c0_5, %c0_6] : memref<1x32xf32, #tpu.memory_space<vmem>>, vector<1x32xf32>
    %c0_7 = arith.constant 0 : index
    %c0_8 = arith.constant 0 : index
    %4 = vector.load %arg1[%c0_7, %c0_8] : memref<16x32xf32, #tpu.memory_space<vmem>>, vector<16x32xf32>
    %cst = arith.constant dense<0.000000e+00> : vector<16x32xf32>
    %5 = tpu.matmul %4, %0, %cst {dimension_numbers = #tpu.dot_dimension_numbers<[1], [0], [0], [1], [0, 0, 1, 1], [], []>} : vector<16x32xf32>, vector<32x32xf32>, vector<16x32xf32> -> vector<16x32xf32>
    %6 = vector.broadcast %3 : vector<1x32xf32> to vector<16x32xf32>
    %7 = arith.addf %5, %6 : vector<16x32xf32>
    %c0_9 = arith.constant 0 : index
    %c0_10 = arith.constant 0 : index
    %8 = vector.load %arg2[%c0_9, %c0_10] : memref<16x32xf32, #tpu.memory_space<vmem>>, vector<16x32xf32>
    %c0_11 = arith.constant 0 : index
    %c0_12 = arith.constant 0 : index
    %9 = vector.load %arg3[%c0_11, %c0_12] : memref<16x32xf32, #tpu.memory_space<vmem>>, vector<16x32xf32>
    %cst_13 = arith.constant dense<0.000000e+00> : vector<16x32xf32>
    %10 = tpu.matmul %8, %1, %cst_13 {dimension_numbers = #tpu.dot_dimension_numbers<[1], [0], [0], [1], [0, 0, 1, 1], [], []>} : vector<16x32xf32>, vector<32x32xf32>, vector<16x32xf32> -> vector<16x32xf32>
    %11 = arith.addf %7, %10 : vector<16x32xf32>
    %cst_14 = arith.constant dense<0.000000e+00> : vector<16x32xf32>
    %12 = tpu.matmul %9, %2, %cst_14 {dimension_numbers = #tpu.dot_dimension_numbers<[1], [0], [0], [1], [0, 0, 1, 1], [], []>} : vector<16x32xf32>, vector<32x32xf32>, vector<16x32xf32> -> vector<16x32xf32>
    %13 = arith.addf %11, %12 : vector<16x32xf32>
    %cst_15 = arith.constant dense<0xFF800000> : vector<16xf32>
    %14 = vector.multi_reduction <maximumf>, %13, %cst_15 [1] : vector<16x32xf32> to vector<16xf32>
    %15 = vector.shape_cast %14 : vector<16xf32> to vector<16x1xf32>
    %16 = vector.broadcast %15 : vector<16x1xf32> to vector<16x32xf32>
    %17 = arith.subf %13, %16 : vector<16x32xf32>
    %18 = math.exp %17 : vector<16x32xf32>
    %cst_16 = arith.constant dense<0.000000e+00> : vector<16xf32>
    %19 = vector.multi_reduction <add>, %18, %cst_16 [1] : vector<16x32xf32> to vector<16xf32>
    %20 = vector.shape_cast %19 : vector<16xf32> to vector<16x1xf32>
    %21 = vector.extract_strided_slice %13 {offsets = [0, 0], sizes = [16, 1], strides = [1, 1]} : vector<16x32xf32> to vector<16x1xf32>
    %22 = arith.subf %21, %15 : vector<16x1xf32>
    %23 = math.exp %22 : vector<16x1xf32>
    %24 = arith.divf %23, %20 : vector<16x1xf32>
    %25 = arith.subf %8, %9 : vector<16x32xf32>
    %26 = vector.broadcast %24 : vector<16x1xf32> to vector<16x32xf32>
    %27 = arith.mulf %26, %25 : vector<16x32xf32>
    %28 = arith.addf %9, %27 : vector<16x32xf32>
    %c0_17 = arith.constant 0 : index
    %c0_18 = arith.constant 0 : index
    %29 = vector.load %arg10[%c0_17, %c0_18] : memref<16x32xf32, #tpu.memory_space<vmem>>, vector<16x32xf32>
    tpu.vector_store %arg10[%c0_17, %c0_18], %28 {strides = array<i32>} : memref<16x32xf32, #tpu.memory_space<vmem>>, vector<16x32xf32>,
    %c0_19 = arith.constant 0 : index
    %c0_20 = arith.constant 0 : index
    %30 = vector.load %arg4[%c0_19, %c0_20] : memref<16x32xf32, #tpu.memory_space<vmem>>, vector<16x32xf32>
    %c0_21 = arith.constant 0 : index
    %c0_22 = arith.constant 0 : index
    %31 = vector.load %arg5[%c0_21, %c0_22] : memref<16x32xf32, #tpu.memory_space<vmem>>, vector<16x32xf32>
    %cst_23 = arith.constant dense<0.000000e+00> : vector<16x32xf32>
    %32 = tpu.matmul %30, %1, %cst_23 {dimension_numbers = #tpu.dot_dimension_numbers<[1], [0], [0], [1], [0, 0, 1, 1], [], []>} : vector<16x32xf32>, vector<32x32xf32>, vector<16x32xf32> -> vector<16x32xf32>
    %33 = arith.addf %7, %32 : vector<16x32xf32>
    %cst_24 = arith.constant dense<0.000000e+00> : vector<16x32xf32>
    %34 = tpu.matmul %31, %2, %cst_24 {dimension_numbers = #tpu.dot_dimension_numbers<[1], [0], [0], [1], [0, 0, 1, 1], [], []>} : vector<16x32xf32>, vector<32x32xf32>, vector<16x32xf32> -> vector<16x32xf32>
    %35 = arith.addf %33, %34 : vector<16x32xf32>
    %cst_25 = arith.constant dense<0xFF800000> : vector<16xf32>
    %36 = vector.multi_reduction <maximumf>, %35, %cst_25 [1] : vector<16x32xf32> to vector<16xf32>
    %37 = vector.shape_cast %36 : vector<16xf32> to vector<16x1xf32>
    %38 = vector.broadcast %37 : vector<16x1xf32> to vector<16x32xf32>
    %39 = arith.subf %35, %38 : vector<16x32xf32>
    %40 = math.exp %39 : vector<16x32xf32>
    %cst_26 = arith.constant dense<0.000000e+00> : vector<16xf32>
    %41 = vector.multi_reduction <add>, %40, %cst_26 [1] : vector<16x32xf32> to vector<16xf32>
    %42 = vector.shape_cast %41 : vector<16xf32> to vector<16x1xf32>
    %43 = vector.extract_strided_slice %35 {offsets = [0, 0], sizes = [16, 1], strides = [1, 1]} : vector<16x32xf32> to vector<16x1xf32>
    %44 = arith.subf %43, %37 : vector<16x1xf32>
    %45 = math.exp %44 : vector<16x1xf32>
    %46 = arith.divf %45, %42 : vector<16x1xf32>
    %47 = arith.subf %30, %31 : vector<16x32xf32>
    %48 = vector.broadcast %46 : vector<16x1xf32> to vector<16x32xf32>
    %49 = arith.mulf %48, %47 : vector<16x32xf32>
    %50 = arith.addf %31, %49 : vector<16x32xf32>
    %c0_27 = arith.constant 0 : index
    %c0_28 = arith.constant 0 : index
    %51 = vector.load %arg11[%c0_27, %c0_28] : memref<16x32xf32, #tpu.memory_space<vmem>>, vector<16x32xf32>
    tpu.vector_store %arg11[%c0_27, %c0_28], %50 {strides = array<i32>} : memref<16x32xf32, #tpu.memory_space<vmem>>, vector<16x32xf32>,
    return
  }
  func.func @transform_0(%arg0: i32) -> (i32, i32) {
    %c0_i32 = arith.constant 0 : i32
    %c0_i32_0 = arith.constant 0 : i32
    return %arg0, %c0_i32 : i32, i32
  }
  func.func @transform_1(%arg0: i32) -> (i32, i32) {
    %c0_i32 = arith.constant 0 : i32
    %c0_i32_0 = arith.constant 0 : i32
    return %arg0, %c0_i32 : i32, i32
  }
  func.func @transform_2(%arg0: i32) -> (i32, i32) {
    %c0_i32 = arith.constant 0 : i32
    %c0_i32_0 = arith.constant 0 : i32
    return %arg0, %c0_i32 : i32, i32
  }
  func.func @transform_3(%arg0: i32) -> (i32, i32) {
    %c0_i32 = arith.constant 0 : i32
    %c0_i32_0 = arith.constant 0 : i32
    return %arg0, %c0_i32 : i32, i32
  }
  func.func @transform_4(%arg0: i32) -> (i32, i32) {
    %c0_i32 = arith.constant 0 : i32
    %c0_i32_0 = arith.constant 0 : i32
    return %arg0, %c0_i32 : i32, i32
  }
  func.func @transform_5(%arg0: i32) -> (i32, i32) {
    %c0_i32 = arith.constant 0 : i32
    %c0_i32_0 = arith.constant 0 : i32
    %c0_i32_1 = arith.constant 0 : i32
    return %c0_i32, %c0_i32_0 : i32, i32
  }
  func.func @transform_6(%arg0: i32) -> (i32, i32) {
    %c0_i32 = arith.constant 0 : i32
    %c0_i32_0 = arith.constant 0 : i32
    %c0_i32_1 = arith.constant 0 : i32
    return %c0_i32, %c0_i32_0 : i32, i32
  }
  func.func @transform_7(%arg0: i32) -> (i32, i32) {
    %c0_i32 = arith.constant 0 : i32
    %c0_i32_0 = arith.constant 0 : i32
    %c0_i32_1 = arith.constant 0 : i32
    return %c0_i32, %c0_i32_0 : i32, i32
  }
  func.func @transform_8(%arg0: i32) -> (i32, i32) {
    %c0_i32 = arith.constant 0 : i32
    %c0_i32_0 = arith.constant 0 : i32
    %c0_i32_1 = arith.constant 0 : i32
    return %c0_i32, %c0_i32_0 : i32, i32
  }
  func.func @transform_9(%arg0: i32) -> (i32, i32) {
    %c0_i32 = arith.constant 0 : i32
    %c0_i32_0 = arith.constant 0 : i32
    return %arg0, %c0_i32 : i32, i32
  }
  func.func @transform_10(%arg0: i32) -> (i32, i32) {
    %c0_i32 = arith.constant 0 : i32
    %c0_i32_0 = arith.constant 0 : i32
    return %arg0, %c0_i32 : i32, i32
  }
}

</mosaic_0001>

<bundles_post_ra>
// kernel: tpu_custom_call.1
= control target key start
LH: loop header
LB: loop body
LE: loop exit
PB: predicated region body
PF: predicated region fallthrough
CT: control target
= control target key end

     0   :  { %16 = vsyncpa [#allocation3], 0  ;;  %s1012_s0 = inlined_call_operand.hbm [shape: f32[16,32], index: 0, kind: input, shape index: {}]   ;;  %s1013_s1 = inlined_call_operand.hbm [shape: f32[16,32], index: 1, kind: input, shape index: {}]   ;;  %s1014_s2 = inlined_call_operand.hbm [shape: f32[16,32], index: 2, kind: input, shape index: {}]   ;;  %s1015_s3 = inlined_call_operand.hbm [shape: f32[16,32], index: 3, kind: input, shape index: {}]   ;;  %s1016_s4 = inlined_call_operand.hbm [shape: f32[16,32], index: 4, kind: input, shape index: {}]   ;;  %s1017_s5 = inlined_call_operand.hbm [shape: f32[32,32], index: 5, kind: input, shape index: {}]   ;;  %s1018_s6 = inlined_call_operand.hbm [shape: f32[32,32], index: 6, kind: input, shape index: {}]   ;;  %s1019_s7 = inlined_call_operand.hbm [shape: f32[32,32], index: 7, kind: input, shape index: {}]   ;;  %s1020_s8 = inlined_call_operand.vmem [shape: f32[1,32], index: 8, kind: input, shape index: {}]   ;;  %s1021_s9 = inlined_call_operand.hbm [shape: f32[16,32], index: 9, kind: output, shape index: {0}]   ;;  %s1022_s10 = inlined_call_operand.hbm [shape: f32[16,32], index: 10, kind: output, shape index: {1}]  }
   0x1   :  { %17 = vsyncpa [#allocation6], 0 }
   0x2   :  { %18 = vsyncpa [#allocation9], 0 }
   0x3   :  { %19 = vsyncpa [#allocation12], 0 }
   0x4   :  { %20 = vsyncpa [#allocation15], 0 }
   0x5   :  { %21 = vsyncpa [#allocation4], 0 }
   0x6   :  { %22 = vsyncpa [#allocation18], 0  ;;  %s40_s15 = sshll.u32 %s1013_s1, 4  ;;  %s815_s16 = smov [#allocation5]   ;;  %s41_s15 = int_to_ptr.hbm [resolvable:$true] %s40_s15 }
   0x7   :  { %s42_s17 = sshll.u32 %s815_s16, 4  ;;  %s66_s20 = sshll.u32 %s1015_s3, 4  ;;  %s43_s17 = int_to_ptr.vmem [resolvable:$true] %s42_s17  ;;  %s67_s20 = int_to_ptr.hbm [resolvable:$true] %s66_s20 }
   0x8   :  { %s816_s21 = smov 128   ;;  %s817_s22 = smov 8  }
   0x9   :  { %48 = dma.hbm_to_vmem [thread:$0]  %s41_s15, 256, %s43_s17, [#allocation6], %s816_s21, %s816_s21, %s817_s22  }
   0xa   :  { %s818_s23 = smov [#allocation8]   ;;  %s92_s1 = sshll.u32 %s1017_s5, 4  ;;  %s93_s1 = int_to_ptr.hbm [resolvable:$true] %s92_s1 }
   0xb   :  { %s68_s24 = sshll.u32 %s818_s23, 4  ;;  %s27_s28 = sshll.u32 %s1012_s0, 4  ;;  %s69_s24 = int_to_ptr.vmem [resolvable:$true] %s68_s24  ;;  %s28_s28 = int_to_ptr.hbm [resolvable:$true] %s27_s28 }
   0xc   :  { %74 = dma.hbm_to_vmem [thread:$0]  %s67_s20, 256, %s69_s24, [#allocation9], %s816_s21, %s816_s21, %s817_s22  }
   0xd   :  { %s819_s29 = smov [#allocation11]   ;;  %s820_s11 = smov [#allocation2]  }
   0xe   :  { %s94_s30 = sshll.u32 %s819_s29, 4  ;;  %s29_s5 = sshll.u32 %s820_s11, 4  ;;  %s95_s30 = int_to_ptr.vmem [resolvable:$true] %s94_s30  ;;  %s30_s5 = int_to_ptr.vmem [resolvable:$true] %s29_s5 }
   0xf   :  { %100 = dma.hbm_to_vmem [thread:$0]  %s93_s1, 512, %s95_s30, [#allocation12], %s816_s21, %s816_s21, %s817_s22  }
  0x10   :  { %s53_s14 = sshll.u32 %s1014_s2, 4  ;;  %s79_s16 = sshll.u32 %s1016_s4, 4  ;;  %s54_s14 = int_to_ptr.hbm [resolvable:$true] %s53_s14  ;;  %s80_s16 = int_to_ptr.hbm [resolvable:$true] %s79_s16 }
  0x11   :  { %35 = dma.hbm_to_vmem [thread:$0]  %s28_s28, 256, %s30_s5, [#allocation3], %s816_s21, %s816_s21, %s817_s22  }
  0x12   :  { %s821_s17 = smov [#allocation7]   ;;  %s822_s19 = smov [#allocation10]  }
  0x13   :  { %s55_s18 = sshll.u32 %s821_s17, 4  ;;  %s81_s2 = sshll.u32 %s822_s19, 4  ;;  %s56_s18 = int_to_ptr.vmem [resolvable:$true] %s55_s18  ;;  %s82_s2 = int_to_ptr.vmem [resolvable:$true] %s81_s2 }
  0x14   :  { %61 = dma.hbm_to_vmem [thread:$0]  %s54_s14, 256, %s56_s18, [#allocation6], %s816_s21, %s816_s21, %s817_s22  }
  0x15   :  { %s105_s24 = sshll.u32 %s1018_s6, 4  ;;  %s118_s26 = sshll.u32 %s1019_s7, 4  ;;  %s106_s24 = int_to_ptr.hbm [resolvable:$true] %s105_s24  ;;  %s119_s26 = int_to_ptr.hbm [resolvable:$true] %s118_s26 }
  0x16   :  { %87 = dma.hbm_to_vmem [thread:$0]  %s80_s16, 256, %s82_s2, [#allocation9], %s816_s21, %s816_s21, %s817_s22  }
  0x17   :  { %s823_s1 = smov [#allocation13]   ;;  %s824_s27 = smov [#allocation14]  }
  0x18   :  { %s107_s3 = sshll.u32 %s823_s1, 4  ;;  %s120_s6 = sshll.u32 %s824_s27, 4  ;;  %s108_s3 = int_to_ptr.vmem [resolvable:$true] %s107_s3  ;;  %s121_s6 = int_to_ptr.vmem [resolvable:$true] %s120_s6 }
  0x19   :  { %113 = dma.hbm_to_vmem [thread:$0]  %s106_s24, 512, %s108_s3, [#allocation12], %s816_s21, %s816_s21, %s817_s22  }
  0x1a   :  { %126 = dma.hbm_to_vmem [thread:$0]  %s119_s26, 512, %s121_s6, [#allocation15], %s816_s21, %s816_s21, %s817_s22  }
  0x1b   :  { %801 = dma.done.wait [#allocation3], 256  }
  0x1c   :  { %802 = vsyncadd [#allocation3], 4294967040 }
  0x1d   :  { %803 = dma.done.wait [#allocation6], 512  }
  0x1e   :  { %804 = vsyncadd [#allocation6], 4294966784 }
  0x1f   :  { %805 = dma.done.wait [#allocation9], 512  }
  0x20   :  { %806 = vsyncadd [#allocation9], 4294966784 }
  0x21   :  { %807 = dma.done.wait [#allocation12], 1024  }
  0x22   :  { %808 = vsyncadd [#allocation12], 4294966272 }
  0x23   :  { %809 = dma.done.wait [#allocation15], 512  }
  0x24   :  { %810 = vsyncadd [#allocation15], 4294966784  ;;  %v164_v0 = vld [vmem:[#allocation11 + $0x18] sm:$0xff]  ;;  %v163_v2 = vld [vmem:[#allocation11 + $0x10] sm:$0xff]  ;;  %vm179_vm0 = vcmask 261120   ;;  %s492_s5 = sshll.u32 %s1022_s10, 4  ;;  %s493_s5 = int_to_ptr.hbm [resolvable:$true] %s492_s5 }
  0x25   :  { %v168_v1 = vld [vmem:[#allocation13 + $0x18] sm:$0xff]  ;;  %198 = vmatpush.msra.mxu0 %v164_v0  ;;  %524 = vmatpush.msra.mxu1 %v164_v0  ;;  %v167_v3 = vld [vmem:[#allocation13 + $0x10] sm:$0xff]  ;;  %v162_v5 = vld [vmem:[#allocation11 + $0x8] sm:$0xff]  ;;  %s827_s12 = smov [#allocation16]   ;;  %s479_s10 = sshll.u32 %s1021_s9, 4  ;;  %s480_s10 = int_to_ptr.hbm [resolvable:$true] %s479_s10 }
  0x26   :  { %v172_v4 = vld [vmem:[#allocation14 + $0x18] sm:$0xff]  ;;  %363 = vmatpush.msra.mxu3 %v168_v1  ;;  %v171_v6 = vld [vmem:[#allocation14 + $0x10] sm:$0xff]  ;;  %v166_v7 = vld [vmem:[#allocation13 + $0x8] sm:$0xff]  ;;  %s477_s13 = sshll.u32 %s827_s12, 4  ;;  %s478_s13 = int_to_ptr.vmem [resolvable:$true] %s477_s13 }
  0x27   :  { %262 = vmatpush.msra.mxu2 %v172_v4  ;;  %199 = vmatpush.msra.mxu0 %v163_v2  ;;  %v161_v8 = vld [vmem:[#allocation11] sm:$0xff]  ;;  %v170_v9 = vld [vmem:[#allocation14 + $0x8] sm:$0xff]  ;;  %v174_v11 = vld [vmem:[#allocation2] sm:$0xff] }
  0x28   :  { %525 = vmatpush.msra.mxu1 %v163_v2  ;;  %364 = vmatpush.msra.mxu3 %v167_v3  ;;  %v165_v10 = vld [vmem:[#allocation13] sm:$0xff]  ;;  %v175_v12 = vld [vmem:[#allocation2 + $0x8] sm:$0xff]  ;;  %v937_v15 = vld [vmem:[#allocation7] sm:$0xff] }
  0x29   :  { %263 = vmatpush.msra.mxu2 %v171_v6  ;;  %200 = vmatpush.msra.mxu0 %v162_v5  ;;  %v931_v13 = vld [vmem:[#allocation8] sm:$0xff]  ;;  %v943_v17 = vld [vmem:[#allocation8 + $0x8] sm:$0xff]  ;;  %v945_v18 = vld [vmem:[#allocation10] sm:$0xff] }
  0x2a   :  { %526 = vmatpush.msra.mxu1 %v162_v5  ;;  %365 = vmatpush.msra.mxu3 %v166_v7  ;;  %v169_v14 = vld [vmem:[#allocation14] sm:$0xff]  ;;  %v953_v19 = vld [vmem:[#allocation7 + $0x8] sm:$0xff]  ;;  %v957_v20 = vld [vmem:[#allocation5 + $0x8] sm:$0xff] }
  0x2b   :  { %264 = vmatpush.msra.mxu2 %v170_v9  ;;  %201 = vmatpush.msra.mxu0 %v161_v8  ;;  %v941_v16 = vld [vmem:[#allocation5] sm:$0xff]  ;;  %v959_v21 = vld [vmem:[#allocation10 + $0x8] sm:$0xff]  ;;  %v544_v24 = vld [vmem:[%s1020_s8] ss:$0 sm:$0xff]  ;;  %s826_s8 = smov [#allocation17]  }
  0x2c   :  { %527 = vmatpush.msra.mxu1 %v161_v8  ;;  %366 = vmatpush.msra.mxu3 %v165_v10  ;;  %s490_s29 = sshll.u32 %s826_s8, 4  ;;  %s491_s29 = int_to_ptr.vmem [resolvable:$true] %s490_s29 }
  0x2d   :  { %514 = vmatmul.msk.f32.vlgmr.msra.gmra.mxu0 %vm179_vm0, %v174_v11  ;;  %515 = vmatmul.msk.f32.vlgmr.msra.gmra.mxu1 %vm179_vm0, %v175_v12 }
  0x2e   :  { %520 = vmatmul.msk.f32.vlgmr.msra.gmra.mxu3 %vm179_vm0, %v931_v13  ;;  %231 = vmatpush.msrb.mxu1 %v168_v1 }
  0x2f   :  { %394 = vmatpush.msrb.mxu0 %v172_v4  ;;  %265 = vmatpush.msra.mxu2 %v169_v14 }
  0x30   :  { %232 = vmatpush.msrb.mxu1 %v167_v3  ;;  %518 = vmatmul.msk.f32.vlgmr.msra.gmra.mxu2 %vm179_vm0, %v937_v15  ;;  %v825_v3 = vmov 0  }
  0x31   :  { %395 = vmatpush.msrb.mxu0 %v171_v6  ;;  %543 = vset.pattern.permute.xlu1 %v825_v3 }
  0x32   :  { %233 = vmatpush.msrb.mxu1 %v166_v7  ;;  %541 = vset.pattern.permute.xlu2 %v825_v3 }
  0x33   :  { %396 = vmatpush.msrb.mxu0 %v170_v9  ;;  %542 = vset.pattern.permute.xlu0 %v825_v3 }
  0x34   :  { %234 = vmatpush.msrb.mxu1 %v165_v10 }
  0x35   :  { %397 = vmatpush.msrb.mxu0 %v169_v14  ;;  %516 = vmatmul.msk.f32.vlgmr.msrb.gmra.mxu1 %vm179_vm0, %v941_v16 }
  0x36   :  { %521 = vmatmul.msk.f32.gmra.mxu3 %vm179_vm0, %v943_v17  ;;  %522 = vmatmul.msk.f32.vlgmr.msrb.gmra.mxu0 %vm179_vm0, %v945_v18 }
  0x38   :  { %519 = vmatmul.msk.f32.gmra.mxu2 %vm179_vm0, %v953_v19 }
  0x3d   :  { %517 = vmatmul.msk.f32.gmra.mxu1 %vm179_vm0, %v957_v20 }
  0x3e   :  { %523 = vmatmul.msk.f32.gmra.mxu0 %vm179_vm0, %v959_v21 }
  0xaa   :  { %v203_v22 = vpop.f32.mrf.mxu0  ;;  %v206_v23 = vpop.f32.mrf.mxu1 }
  0xab   :  { %v204_v25 = vadd.f32 %v544_v24, %v203_v22  ;;  %v207_v35 = vadd.f32 %v544_v24, %v206_v23 }
  0xb1   :  { %v368_v26 = vpop.f32.mrf.mxu3 }
  0xb2   :  { %v374_v27 = vadd.f32 %v368_v26, %v204_v25  ;;  %v236_v28 = vpop.f32.mrf.mxu1 }
  0xb3   :  { %v242_v29 = vadd.f32 %v236_v28, %v204_v25  ;;  %v399_v30 = vpop.f32.mrf.mxu0  ;;  %v267_v32 = vpop.f32.mrf.mxu2 }
  0xb4   :  { %v405_v31 = vadd.f32 %v399_v30, %v374_v27 }
  0xb5   :  { %v273_v33 = vadd.f32 %v267_v32, %v242_v29 }
  0xb6   :  { %v407_v34 = vsel %vm179_vm0, %v405_v31, -inf }
  0xb7   :  { %408 = vmax.xlane.f32.xlu1 %v407_v34  ;;  %v275_v36 = vsel %vm179_vm0, %v273_v33, -inf }
  0xb8   :  { %276 = vmax.xlane.f32.xlu0 %v275_v36 }
  0xb9   :  { %v371_v37 = vpop.f32.mrf.mxu3 }
  0xba   :  { %v375_v38 = vadd.f32 %v371_v37, %v207_v35  ;;  %v239_v39 = vpop.f32.mrf.mxu1 }
  0xbb   :  { %v243_v40 = vadd.f32 %v239_v39, %v207_v35  ;;  %v402_v41 = vpop.f32.mrf.mxu0  ;;  %v270_v43 = vpop.f32.mrf.mxu2 }
  0xbc   :  { %v406_v42 = vadd.f32 %v402_v41, %v375_v38 }
  0xbd   :  { %v274_v44 = vadd.f32 %v270_v43, %v243_v40 }
  0xbe   :  { %v410_v45 = vsel %vm179_vm0, %v406_v42, -inf }
  0xbf   :  { %411 = vmax.xlane.f32.xlu1 %v410_v45  ;;  %v278_v46 = vsel %vm179_vm0, %v274_v44, -inf }
  0xc0   :  { %279 = vmax.xlane.f32.xlu0 %v278_v46 }
 0x12a   :  { %v409_v47 = vpop.xlane.xlu1 %408 }
 0x12b   :  { %v413_v48 = vsub.f32 %v405_v31, %v409_v47  ;;  %v277_v49 = vpop.xlane.xlu0 %276 }
 0x12c   :  { %v281_v50 = vsub.f32 %v273_v33, %v277_v49 }
 0x12d   :  { %v415_v51 = vmul.f32 1.442695, %v413_v48 }
 0x12e   :  { %v283_v52 = vmul.f32 1.442695, %v281_v50 }
 0x12f   :  { %545 = vpow2.f32 %v415_v51 }
 0x130   :  { %547 = vpow2.f32 %v283_v52 }
 0x132   :  { %v412_v53 = vpop.xlane.xlu1 %411 }
 0x133   :  { %v414_v54 = vsub.f32 %v406_v42, %v412_v53  ;;  %v280_v55 = vpop.xlane.xlu0 %279 }
 0x134   :  { %v282_v56 = vsub.f32 %v274_v44, %v280_v55 }
 0x135   :  { %v546_v57 = vpop.eup %545  ;;  %v417_v58 = vmul.f32 1.442695, %v414_v54 }
 0x136   :  { %v548_v59 = vpop.eup %547  ;;  %v285_v60 = vmul.f32 1.442695, %v282_v56  ;;  %v419_v61 = vsel %vm179_vm0, %v546_v57, 0.0 }
 0x137   :  { %549 = vpow2.f32 %v417_v58  ;;  %420 = vadd.xlane.f32.xlu0 %v419_v61  ;;  %v287_v62 = vsel %vm179_vm0, %v548_v59, 0.0 }
 0x138   :  { %551 = vpow2.f32 %v285_v60  ;;  %288 = vadd.xlane.f32.xlu2 %v287_v62  ;;  %v323_v60 = vsub.f32 %v941_v16, %v937_v15 }
 0x13d   :  { %v974_v63 = vpop.eup %549 }
 0x13e   :  { %v976_v0 = vpop.eup %551  ;;  %v422_v1 = vsel %vm179_vm0, %v974_v63, 0.0 }
 0x13f   :  { %423 = vadd.xlane.f32.xlu1 %v422_v1  ;;  %v290_v2 = vsel %vm179_vm0, %v976_v0, 0.0 }
 0x140   :  { %291 = vadd.xlane.f32.xlu2 %v290_v2  ;;  %v456_v2 = vsub.f32 %v943_v17, %v959_v21  ;;  %v324_v17 = vsub.f32 %v957_v20, %v953_v19 }
 0x1aa   :  { %v421_v4 = vpop.xlane.xlu0 %420 }
 0x1ab   :  { %553 = vrcp.f32 %v421_v4  ;;  %v289_v5 = vpop.xlane.xlu2 %288  ;;  %v436_v14 = vand.u32 2147483648, %v421_v4  ;;  %v434_v25 = vand.u32 2147483647, %v421_v4  ;;  %vm430_vm3 = vweird.f32 %v421_v4 }
 0x1ac   :  { %555 = vrcp.f32 %v289_v5  ;;  %v304_v24 = vand.u32 2147483648, %v289_v5  ;;  %v302_v27 = vand.u32 2147483647, %v289_v5  ;;  %vm298_vm4 = vweird.f32 %v289_v5 }
 0x1ad   :  { %v437_v30 = vor.u32 1.1754944e-38, %v436_v14  ;;  %vm435_vm6 = vcmp.eq.f32.partialorder %v434_v25, 8.507059e+37 }
 0x1ae   :  { %v305_v33 = vor.u32 1.1754944e-38, %v304_v24  ;;  %vm303_vm8 = vcmp.eq.f32.partialorder %v302_v27, 8.507059e+37 }
 0x1b1   :  { %v554_v6 = vpop.eup %553 }
 0x1b2   :  { %v556_v7 = vpop.eup %555  ;;  %v426_v8 = vmul.f32 %v554_v6, %v421_v4  ;;  %v424_v9 = vpop.xlane.xlu1 %423  ;;  %vm431_vm1 = vweird.f32 %v554_v6 }
 0x1b3   :  { %v294_v10 = vmul.f32 %v556_v7, %v289_v5  ;;  %557 = vrcp.f32 %v424_v9  ;;  %v292_v11 = vpop.xlane.xlu2 %291  ;;  %vm299_vm2 = vweird.f32 %v556_v7  ;;  %vm432_vm5 = vmor %vm430_vm3, %vm431_vm1  ;;  %v451_v42 = vand.u32 2147483648, %v424_v9 }
 0x1b4   :  { %v427_v12 = vsub.f32 1.0, %v426_v8  ;;  %559 = vrcp.f32 %v292_v11  ;;  %vm300_vm7 = vmor %vm298_vm4, %vm299_vm2  ;;  %v319_v46 = vand.u32 2147483648, %v292_v11  ;;  %v449_v47 = vand.u32 2147483647, %v424_v9 }
 0x1b5   :  { %v295_v22 = vsub.f32 1.0, %v294_v10  ;;  %v317_v49 = vand.u32 2147483647, %v292_v11  ;;  %vm445_vm11 = vweird.f32 %v424_v9  ;;  %v452_v51 = vor.u32 1.1754944e-38, %v451_v42 }
 0x1b6   :  { %v428_v23 = vmul.f32 %v554_v6, %v427_v12  ;;  %vm313_vm12 = vweird.f32 %v292_v11  ;;  %v320_v53 = vor.u32 1.1754944e-38, %v319_v46  ;;  %vm450_vm14 = vcmp.eq.f32.partialorder %v449_v47, 8.507059e+37 }
 0x1b7   :  { %v296_v26 = vmul.f32 %v556_v7, %v295_v22  ;;  %vm318_vm1 = vcmp.eq.f32.partialorder %v317_v49, 8.507059e+37 }
 0x1b8   :  { %v429_v28 = vadd.f32 %v554_v6, %v428_v23 }
 0x1b9   :  { %v558_v29 = vpop.eup %557  ;;  %v297_v31 = vadd.f32 %v556_v7, %v296_v26 }
 0x1ba   :  { %v560_v32 = vpop.eup %559  ;;  %v441_v34 = vmul.f32 %v558_v29, %v424_v9  ;;  %v433_v35 = vsel %vm432_vm5, %v554_v6, %v429_v28  ;;  %vm446_vm9 = vweird.f32 %v558_v29 }
 0x1bb   :  { %v309_v36 = vmul.f32 %v560_v32, %v292_v11  ;;  %v438_v37 = vsel %vm435_vm6, %v437_v30, %v433_v35  ;;  %v301_v38 = vsel %vm300_vm7, %v556_v7, %v297_v31  ;;  %vm314_vm10 = vweird.f32 %v560_v32  ;;  %vm447_vm13 = vmor %vm445_vm11, %vm446_vm9 }
 0x1bc   :  { %v442_v39 = vsub.f32 1.0, %v441_v34  ;;  %v439_v40 = vmul.f32 %v546_v57, %v438_v37  ;;  %v306_v41 = vsel %vm303_vm8, %v305_v33, %v301_v38  ;;  %vm315_vm15 = vmor %vm313_vm12, %vm314_vm10 }
 0x1bd   :  { %v310_v43 = vsub.f32 1.0, %v309_v36  ;;  %v307_v44 = vmul.f32 %v548_v59, %v306_v41 }
 0x1be   :  { %v443_v45 = vmul.f32 %v558_v29, %v442_v39  ;;  %459 = vperm.xlu1 %543, %v439_v40  }
 0x1bf   :  { %v311_v48 = vmul.f32 %v560_v32, %v310_v43  ;;  %327 = vperm.xlu2 %541, %v307_v44  }
 0x1c0   :  { %v444_v50 = vadd.f32 %v558_v29, %v443_v45 }
 0x1c1   :  { %v312_v52 = vadd.f32 %v560_v32, %v311_v48 }
 0x1c2   :  { %v448_v54 = vsel %vm447_vm13, %v558_v29, %v444_v50 }
 0x1c3   :  { %v453_v55 = vsel %vm450_vm14, %v452_v51, %v448_v54  ;;  %v316_v56 = vsel %vm315_vm15, %v560_v32, %v312_v52 }
 0x1c4   :  { %v321_v57 = vsel %vm318_vm1, %v320_v53, %v316_v56  ;;  %v454_v58 = vmul.f32 %v974_v63, %v453_v55 }
 0x1c5   :  { %v322_v59 = vmul.f32 %v976_v0, %v321_v57  ;;  %v455_v0 = vsub.f32 %v931_v13, %v945_v18 }
 0x1c7   :  { %464 = vperm.xlu2 %541, %v454_v58   ;;  %332 = vperm.xlu0 %542, %v322_v59  }
 0x219   :  { %v328_v61 = vpop.permute.xlu2 %327 }
 0x21a   :  { %v335_v62 = vmul.f32 %v328_v61, %v323_v60 }
 0x21c   :  { %v337_v1 = vadd.f32 %v335_v62, %v937_v15 }
 0x21e   :  { %339 = vst.msk [vmem:[#allocation16] sm:$0xff] %vm179_vm0, %v337_v1 }
 0x221   :  { %v465_v3 = vpop.permute.xlu2 %464 }
 0x222   :  { %v468_v4 = vmul.f32 %v465_v3, %v456_v2 }
 0x224   :  { %v470_v63 = vadd.f32 %v468_v4, %v959_v21 }
 0x226   :  { %472 = vst.msk [vmem:[#allocation17 + $0x8] sm:$0xff] %vm179_vm0, %v470_v63 }
 0x230   :  { %v460_v5 = vpop.permute.xlu1 %459 }
 0x231   :  { %v467_v15 = vmul.f32 %v460_v5, %v455_v0 }
 0x233   :  { %v469_v16 = vadd.f32 %v467_v15, %v945_v18 }
 0x235   :  { %471 = vst.msk [vmem:[#allocation17] sm:$0xff] %vm179_vm0, %v469_v16 }
 0x236   :  { %498 = dma.vmem_to_hbm [thread:$0]  %s491_s29, 256, %s493_s5, [#allocation18], %s816_s21, %s816_s21, %s817_s22  }
 0x239   :  { %v333_v13 = vpop.permute.xlu0 %332 }
 0x23a   :  { %v336_v21 = vmul.f32 %v333_v13, %v324_v17 }
 0x23c   :  { %v338_v18 = vadd.f32 %v336_v21, %v953_v19 }
 0x23e   :  { %340 = vst.msk [vmem:[#allocation16 + $0x8] sm:$0xff] %vm179_vm0, %v338_v18 }
 0x23f   :  { %485 = dma.vmem_to_hbm [thread:$0]  %s478_s13, 256, %s480_s10, [#allocation4], %s816_s21, %s816_s21, %s817_s22  }
 0x240   :  { %811 = dma.done.wait [#allocation4], 256  }
 0x241   :  { %812 = vsyncadd [#allocation4], 4294967040 }
 0x242   :  { %813 = dma.done.wait [#allocation18], 256  }
 0x243   :  { %814 = vsyncadd [#allocation18], 4294967040 }
 0x244   :  { %507 = vsyncpa [#allocation3], 1 }
 0x245   :  { %508 = vsyncpa [#allocation6], 1 }
 0x246   :  { %509 = vsyncpa [#allocation9], 1 }
 0x247   :  { %510 = vsyncpa [#allocation12], 1 }
 0x248   :  { %511 = vsyncpa [#allocation15], 1 }
 0x249   :  { %512 = vsyncpa [#allocation4], 1 }
 0x24a   :  { %513 = vsyncpa [#allocation18], 1 }

// kernel: tpu_custom_call.1
= control target key start
LH: loop header
LB: loop body
LE: loop exit
PB: predicated region body
PF: predicated region fallthrough
CT: control target
= control target key end

     0   :  { %16 = vsyncpa [#allocation3], 0  ;;  %s1012_s0 = inlined_call_operand.hbm [shape: f32[16,32], index: 0, kind: input, shape index: {}]   ;;  %s1013_s1 = inlined_call_operand.hbm [shape: f32[16,32], index: 1, kind: input, shape index: {}]   ;;  %s1014_s2 = inlined_call_operand.hbm [shape: f32[16,32], index: 2, kind: input, shape index: {}]   ;;  %s1015_s3 = inlined_call_operand.hbm [shape: f32[16,32], index: 3, kind: input, shape index: {}]   ;;  %s1016_s4 = inlined_call_operand.hbm [shape: f32[16,32], index: 4, kind: input, shape index: {}]   ;;  %s1017_s5 = inlined_call_operand.hbm [shape: f32[32,32], index: 5, kind: input, shape index: {}]   ;;  %s1018_s6 = inlined_call_operand.hbm [shape: f32[32,32], index: 6, kind: input, shape index: {}]   ;;  %s1019_s7 = inlined_call_operand.hbm [shape: f32[32,32], index: 7, kind: input, shape index: {}]   ;;  %s1020_s8 = inlined_call_operand.vmem [shape: f32[1,32], index: 8, kind: input, shape index: {}]   ;;  %s1021_s9 = inlined_call_operand.hbm [shape: f32[16,32], index: 9, kind: output, shape index: {0}]   ;;  %s1022_s10 = inlined_call_operand.hbm [shape: f32[16,32], index: 10, kind: output, shape index: {1}]  }
   0x1   :  { %17 = vsyncpa [#allocation6], 0 }
   0x2   :  { %18 = vsyncpa [#allocation9], 0 }
   0x3   :  { %19 = vsyncpa [#allocation12], 0 }
   0x4   :  { %20 = vsyncpa [#allocation15], 0 }
   0x5   :  { %21 = vsyncpa [#allocation4], 0 }
   0x6   :  { %22 = vsyncpa [#allocation18], 0  ;;  %s40_s15 = sshll.u32 %s1013_s1, 4  ;;  %s815_s16 = smov [#allocation5]   ;;  %s41_s15 = int_to_ptr.hbm [resolvable:$true] %s40_s15 }
   0x7   :  { %s42_s17 = sshll.u32 %s815_s16, 4  ;;  %s66_s20 = sshll.u32 %s1015_s3, 4  ;;  %s43_s17 = int_to_ptr.vmem [resolvable:$true] %s42_s17  ;;  %s67_s20 = int_to_ptr.hbm [resolvable:$true] %s66_s20 }
   0x8   :  { %s816_s21 = smov 128   ;;  %s817_s22 = smov 8  }
   0x9   :  { %48 = dma.hbm_to_vmem [thread:$0]  %s41_s15, 256, %s43_s17, [#allocation6], %s816_s21, %s816_s21, %s817_s22  }
   0xa   :  { %s818_s23 = smov [#allocation8]   ;;  %s92_s1 = sshll.u32 %s1017_s5, 4  ;;  %s93_s1 = int_to_ptr.hbm [resolvable:$true] %s92_s1 }
   0xb   :  { %s68_s24 = sshll.u32 %s818_s23, 4  ;;  %s27_s28 = sshll.u32 %s1012_s0, 4  ;;  %s69_s24 = int_to_ptr.vmem [resolvable:$true] %s68_s24  ;;  %s28_s28 = int_to_ptr.hbm [resolvable:$true] %s27_s28 }
   0xc   :  { %74 = dma.hbm_to_vmem [thread:$0]  %s67_s20, 256, %s69_s24, [#allocation9], %s816_s21, %s816_s21, %s817_s22  }
   0xd   :  { %s819_s29 = smov [#allocation11]   ;;  %s820_s11 = smov [#allocation2]  }
   0xe   :  { %s94_s30 = sshll.u32 %s819_s29, 4  ;;  %s29_s5 = sshll.u32 %s820_s11, 4  ;;  %s95_s30 = int_to_ptr.vmem [resolvable:$true] %s94_s30  ;;  %s30_s5 = int_to_ptr.vmem [resolvable:$true] %s29_s5 }
   0xf   :  { %100 = dma.hbm_to_vmem [thread:$0]  %s93_s1, 512, %s95_s30, [#allocation12], %s816_s21, %s816_s21, %s817_s22  }
  0x10   :  { %s53_s14 = sshll.u32 %s1014_s2, 4  ;;  %s79_s16 = sshll.u32 %s1016_s4, 4  ;;  %s54_s14 = int_to_ptr.hbm [resolvable:$true] %s53_s14  ;;  %s80_s16 = int_to_ptr.hbm [resolvable:$true] %s79_s16 }
  0x11   :  { %35 = dma.hbm_to_vmem [thread:$0]  %s28_s28, 256, %s30_s5, [#allocation3], %s816_s21, %s816_s21, %s817_s22  }
  0x12   :  { %s821_s17 = smov [#allocation7]   ;;  %s822_s19 = smov [#allocation10]  }
  0x13   :  { %s55_s18 = sshll.u32 %s821_s17, 4  ;;  %s81_s2 = sshll.u32 %s822_s19, 4  ;;  %s56_s18 = int_to_ptr.vmem [resolvable:$true] %s55_s18  ;;  %s82_s2 = int_to_ptr.vmem [resolvable:$true] %s81_s2 }
  0x14   :  { %61 = dma.hbm_to_vmem [thread:$0]  %s54_s14, 256, %s56_s18, [#allocation6], %s816_s21, %s816_s21, %s817_s22  }
  0x15   :  { %s105_s24 = sshll.u32 %s1018_s6, 4  ;;  %s118_s26 = sshll.u32 %s1019_s7, 4  ;;  %s106_s24 = int_to_ptr.hbm [resolvable:$true] %s105_s24  ;;  %s119_s26 = int_to_ptr.hbm [resolvable:$true] %s118_s26 }
  0x16   :  { %87 = dma.hbm_to_vmem [thread:$0]  %s80_s16, 256, %s82_s2, [#allocation9], %s816_s21, %s816_s21, %s817_s22  }
  0x17   :  { %s823_s1 = smov [#allocation13]   ;;  %s824_s27 = smov [#allocation14]  }
  0x18   :  { %s107_s3 = sshll.u32 %s823_s1, 4  ;;  %s120_s6 = sshll.u32 %s824_s27, 4  ;;  %s108_s3 = int_to_ptr.vmem [resolvable:$true] %s107_s3  ;;  %s121_s6 = int_to_ptr.vmem [resolvable:$true] %s120_s6 }
  0x19   :  { %113 = dma.hbm_to_vmem [thread:$0]  %s106_s24, 512, %s108_s3, [#allocation12], %s816_s21, %s816_s21, %s817_s22  }
  0x1a   :  { %126 = dma.hbm_to_vmem [thread:$0]  %s119_s26, 512, %s121_s6, [#allocation15], %s816_s21, %s816_s21, %s817_s22  }
  0x1b   :  { %801 = dma.done.wait [#allocation3], 256  }
  0x1c   :  { %802 = vsyncadd [#allocation3], 4294967040 }
  0x1d   :  { %803 = dma.done.wait [#allocation6], 512  }
  0x1e   :  { %804 = vsyncadd [#allocation6], 4294966784 }
  0x1f   :  { %805 = dma.done.wait [#allocation9], 512  }
  0x20   :  { %806 = vsyncadd [#allocation9], 4294966784 }
  0x21   :  { %807 = dma.done.wait [#allocation12], 1024  }
  0x22   :  { %808 = vsyncadd [#allocation12], 4294966272 }
  0x23   :  { %809 = dma.done.wait [#allocation15], 512  }
  0x24   :  { %810 = vsyncadd [#allocation15], 4294966784  ;;  %v164_v0 = vld [vmem:[#allocation11 + $0x18] sm:$0xff]  ;;  %v163_v2 = vld [vmem:[#allocation11 + $0x10] sm:$0xff]  ;;  %vm179_vm0 = vcmask 261120   ;;  %s492_s5 = sshll.u32 %s1022_s10, 4  ;;  %s493_s5 = int_to_ptr.hbm [resolvable:$true] %s492_s5 }
  0x25   :  { %v168_v1 = vld [vmem:[#allocation13 + $0x18] sm:$0xff]  ;;  %198 = vmatpush.msra.mxu0 %v164_v0  ;;  %524 = vmatpush.msra.mxu1 %v164_v0  ;;  %v167_v3 = vld [vmem:[#allocation13 + $0x10] sm:$0xff]  ;;  %v162_v5 = vld [vmem:[#allocation11 + $0x8] sm:$0xff]  ;;  %s827_s12 = smov [#allocation16]   ;;  %s479_s10 = sshll.u32 %s1021_s9, 4  ;;  %s480_s10 = int_to_ptr.hbm [resolvable:$true] %s479_s10 }
  0x26   :  { %v172_v4 = vld [vmem:[#allocation14 + $0x18] sm:$0xff]  ;;  %363 = vmatpush.msra.mxu3 %v168_v1  ;;  %v171_v6 = vld [vmem:[#allocation14 + $0x10] sm:$0xff]  ;;  %v166_v7 = vld [vmem:[#allocation13 + $0x8] sm:$0xff]  ;;  %s477_s13 = sshll.u32 %s827_s12, 4  ;;  %s478_s13 = int_to_ptr.vmem [resolvable:$true] %s477_s13 }
  0x27   :  { %262 = vmatpush.msra.mxu2 %v172_v4  ;;  %199 = vmatpush.msra.mxu0 %v163_v2  ;;  %v161_v8 = vld [vmem:[#allocation11] sm:$0xff]  ;;  %v170_v9 = vld [vmem:[#allocation14 + $0x8] sm:$0xff]  ;;  %v174_v11 = vld [vmem:[#allocation2] sm:$0xff] }
  0x28   :  { %525 = vmatpush.msra.mxu1 %v163_v2  ;;  %364 = vmatpush.msra.mxu3 %v167_v3  ;;  %v165_v10 = vld [vmem:[#allocation13] sm:$0xff]  ;;  %v175_v12 = vld [vmem:[#allocation2 + $0x8] sm:$0xff]  ;;  %v937_v15 = vld [vmem:[#allocation7] sm:$0xff] }
  0x29   :  { %263 = vmatpush.msra.mxu2 %v171_v6  ;;  %200 = vmatpush.msra.mxu0 %v162_v5  ;;  %v931_v13 = vld [vmem:[#allocation8] sm:$0xff]  ;;  %v943_v17 = vld [vmem:[#allocation8 + $0x8] sm:$0xff]  ;;  %v945_v18 = vld [vmem:[#allocation10] sm:$0xff] }
  0x2a   :  { %526 = vmatpush.msra.mxu1 %v162_v5  ;;  %365 = vmatpush.msra.mxu3 %v166_v7  ;;  %v169_v14 = vld [vmem:[#allocation14] sm:$0xff]  ;;  %v953_v19 = vld [vmem:[#allocation7 + $0x8] sm:$0xff]  ;;  %v957_v20 = vld [vmem:[#allocation5 + $0x8] sm:$0xff] }
  0x2b   :  { %264 = vmatpush.msra.mxu2 %v170_v9  ;;  %201 = vmatpush.msra.mxu0 %v161_v8  ;;  %v941_v16 = vld [vmem:[#allocation5] sm:$0xff]  ;;  %v959_v21 = vld [vmem:[#allocation10 + $0x8] sm:$0xff]  ;;  %v544_v24 = vld [vmem:[%s1020_s8] ss:$0 sm:$0xff]  ;;  %s826_s8 = smov [#allocation17]  }
  0x2c   :  { %527 = vmatpush.msra.mxu1 %v161_v8  ;;  %366 = vmatpush.msra.mxu3 %v165_v10  ;;  %s490_s29 = sshll.u32 %s826_s8, 4  ;;  %s491_s29 = int_to_ptr.vmem [resolvable:$true] %s490_s29 }
  0x2d   :  { %514 = vmatmul.msk.f32.vlgmr.msra.gmra.mxu0 %vm179_vm0, %v174_v11  ;;  %515 = vmatmul.msk.f32.vlgmr.msra.gmra.mxu1 %vm179_vm0, %v175_v12 }
  0x2e   :  { %520 = vmatmul.msk.f32.vlgmr.msra.gmra.mxu3 %vm179_vm0, %v931_v13  ;;  %231 = vmatpush.msrb.mxu1 %v168_v1 }
  0x2f   :  { %394 = vmatpush.msrb.mxu0 %v172_v4  ;;  %265 = vmatpush.msra.mxu2 %v169_v14 }
  0x30   :  { %232 = vmatpush.msrb.mxu1 %v167_v3  ;;  %518 = vmatmul.msk.f32.vlgmr.msra.gmra.mxu2 %vm179_vm0, %v937_v15  ;;  %v825_v3 = vmov 0  }
  0x31   :  { %395 = vmatpush.msrb.mxu0 %v171_v6  ;;  %543 = vset.pattern.permute.xlu1 %v825_v3 }
  0x32   :  { %233 = vmatpush.msrb.mxu1 %v166_v7  ;;  %541 = vset.pattern.permute.xlu2 %v825_v3 }
  0x33   :  { %396 = vmatpush.msrb.mxu0 %v170_v9  ;;  %542 = vset.pattern.permute.xlu0 %v825_v3 }
  0x34   :  { %234 = vmatpush.msrb.mxu1 %v165_v10 }
  0x35   :  { %397 = vmatpush.msrb.mxu0 %v169_v14  ;;  %516 = vmatmul.msk.f32.vlgmr.msrb.gmra.mxu1 %vm179_vm0, %v941_v16 }
  0x36   :  { %521 = vmatmul.msk.f32.gmra.mxu3 %vm179_vm0, %v943_v17  ;;  %522 = vmatmul.msk.f32.vlgmr.msrb.gmra.mxu0 %vm179_vm0, %v945_v18 }
  0x38   :  { %519 = vmatmul.msk.f32.gmra.mxu2 %vm179_vm0, %v953_v19 }
  0x3d   :  { %517 = vmatmul.msk.f32.gmra.mxu1 %vm179_vm0, %v957_v20 }
  0x3e   :  { %523 = vmatmul.msk.f32.gmra.mxu0 %vm179_vm0, %v959_v21 }
  0xaa   :  { %v203_v22 = vpop.f32.mrf.mxu0  ;;  %v206_v23 = vpop.f32.mrf.mxu1 }
  0xab   :  { %v204_v25 = vadd.f32 %v544_v24, %v203_v22  ;;  %v207_v35 = vadd.f32 %v544_v24, %v206_v23 }
  0xb1   :  { %v368_v26 = vpop.f32.mrf.mxu3 }
  0xb2   :  { %v374_v27 = vadd.f32 %v368_v26, %v204_v25  ;;  %v236_v28 = vpop.f32.mrf.mxu1 }
  0xb3   :  { %v242_v29 = vadd.f32 %v236_v28, %v204_v25  ;;  %v399_v30 = vpop.f32.mrf.mxu0  ;;  %v267_v32 = vpop.f32.mrf.mxu2 }
  0xb4   :  { %v405_v31 = vadd.f32 %v399_v30, %v374_v27 }
  0xb5   :  { %v273_v33 = vadd.f32 %v267_v32, %v242_v29 }
  0xb6   :  { %v407_v34 = vsel %vm179_vm0, %v405_v31, -inf }
  0xb7   :  { %408 = vmax.xlane.f32.xlu1 %v407_v34  ;;  %v275_v36 = vsel %vm179_vm0, %v273_v33, -inf }
  0xb8   :  { %276 = vmax.xlane.f32.xlu0 %v275_v36 }
  0xb9   :  { %v371_v37 = vpop.f32.mrf.mxu3 }
  0xba   :  { %v375_v38 = vadd.f32 %v371_v37, %v207_v35  ;;  %v239_v39 = vpop.f32.mrf.mxu1 }
  0xbb   :  { %v243_v40 = vadd.f32 %v239_v39, %v207_v35  ;;  %v402_v41 = vpop.f32.mrf.mxu0  ;;  %v270_v43 = vpop.f32.mrf.mxu2 }
  0xbc   :  { %v406_v42 = vadd.f32 %v402_v41, %v375_v38 }
  0xbd   :  { %v274_v44 = vadd.f32 %v270_v43, %v243_v40 }
  0xbe   :  { %v410_v45 = vsel %vm179_vm0, %v406_v42, -inf }
  0xbf   :  { %411 = vmax.xlane.f32.xlu1 %v410_v45  ;;  %v278_v46 = vsel %vm179_vm0, %v274_v44, -inf }
  0xc0   :  { %279 = vmax.xlane.f32.xlu0 %v278_v46 }
 0x12a   :  { %v409_v47 = vpop.xlane.xlu1 %408 }
 0x12b   :  { %v413_v48 = vsub.f32 %v405_v31, %v409_v47  ;;  %v277_v49 = vpop.xlane.xlu0 %276 }
 0x12c   :  { %v281_v50 = vsub.f32 %v273_v33, %v277_v49 }
 0x12d   :  { %v415_v51 = vmul.f32 1.442695, %v413_v48 }
 0x12e   :  { %v283_v52 = vmul.f32 1.442695, %v281_v50 }
 0x12f   :  { %545 = vpow2.f32 %v415_v51 }
 0x130   :  { %547 = vpow2.f32 %v283_v52 }
 0x132   :  { %v412_v53 = vpop.xlane.xlu1 %411 }
 0x133   :  { %v414_v54 = vsub.f32 %v406_v42, %v412_v53  ;;  %v280_v55 = vpop.xlane.xlu0 %279 }
 0x134   :  { %v282_v56 = vsub.f32 %v274_v44, %v280_v55 }
 0x135   :  { %v546_v57 = vpop.eup %545  ;;  %v417_v58 = vmul.f32 1.442695, %v414_v54 }
 0x136   :  { %v548_v59 = vpop.eup %547  ;;  %v285_v60 = vmul.f32 1.442695, %v282_v56  ;;  %v419_v61 = vsel %vm179_vm0, %v546_v57, 0.0 }
 0x137   :  { %549 = vpow2.f32 %v417_v58  ;;  %420 = vadd.xlane.f32.xlu0 %v419_v61  ;;  %v287_v62 = vsel %vm179_vm0, %v548_v59, 0.0 }
 0x138   :  { %551 = vpow2.f32 %v285_v60  ;;  %288 = vadd.xlane.f32.xlu2 %v287_v62  ;;  %v323_v60 = vsub.f32 %v941_v16, %v937_v15 }
 0x13d   :  { %v974_v63 = vpop.eup %549 }
 0x13e   :  { %v976_v0 = vpop.eup %551  ;;  %v422_v1 = vsel %vm179_vm0, %v974_v63, 0.0 }
 0x13f   :  { %423 = vadd.xlane.f32.xlu1 %v422_v1  ;;  %v290_v2 = vsel %vm179_vm0, %v976_v0, 0.0 }
 0x140   :  { %291 = vadd.xlane.f32.xlu2 %v290_v2  ;;  %v456_v2 = vsub.f32 %v943_v17, %v959_v21  ;;  %v324_v17 = vsub.f32 %v957_v20, %v953_v19 }
 0x1aa   :  { %v421_v4 = vpop.xlane.xlu0 %420 }
 0x1ab   :  { %553 = vrcp.f32 %v421_v4  ;;  %v289_v5 = vpop.xlane.xlu2 %288  ;;  %v436_v14 = vand.u32 2147483648, %v421_v4  ;;  %v434_v25 = vand.u32 2147483647, %v421_v4  ;;  %vm430_vm3 = vweird.f32 %v421_v4 }
 0x1ac   :  { %555 = vrcp.f32 %v289_v5  ;;  %v304_v24 = vand.u32 2147483648, %v289_v5  ;;  %v302_v27 = vand.u32 2147483647, %v289_v5  ;;  %vm298_vm4 = vweird.f32 %v289_v5 }
 0x1ad   :  { %v437_v30 = vor.u32 1.1754944e-38, %v436_v14  ;;  %vm435_vm6 = vcmp.eq.f32.partialorder %v434_v25, 8.507059e+37 }
 0x1ae   :  { %v305_v33 = vor.u32 1.1754944e-38, %v304_v24  ;;  %vm303_vm8 = vcmp.eq.f32.partialorder %v302_v27, 8.507059e+37 }
 0x1b1   :  { %v554_v6 = vpop.eup %553 }
 0x1b2   :  { %v556_v7 = vpop.eup %555  ;;  %v426_v8 = vmul.f32 %v554_v6, %v421_v4  ;;  %v424_v9 = vpop.xlane.xlu1 %423  ;;  %vm431_vm1 = vweird.f32 %v554_v6 }
 0x1b3   :  { %v294_v10 = vmul.f32 %v556_v7, %v289_v5  ;;  %557 = vrcp.f32 %v424_v9  ;;  %v292_v11 = vpop.xlane.xlu2 %291  ;;  %vm299_vm2 = vweird.f32 %v556_v7  ;;  %vm432_vm5 = vmor %vm430_vm3, %vm431_vm1  ;;  %v451_v42 = vand.u32 2147483648, %v424_v9 }
 0x1b4   :  { %v427_v12 = vsub.f32 1.0, %v426_v8  ;;  %559 = vrcp.f32 %v292_v11  ;;  %vm300_vm7 = vmor %vm298_vm4, %vm299_vm2  ;;  %v319_v46 = vand.u32 2147483648, %v292_v11  ;;  %v449_v47 = vand.u32 2147483647, %v424_v9 }
 0x1b5   :  { %v295_v22 = vsub.f32 1.0, %v294_v10  ;;  %v317_v49 = vand.u32 2147483647, %v292_v11  ;;  %vm445_vm11 = vweird.f32 %v424_v9  ;;  %v452_v51 = vor.u32 1.1754944e-38, %v451_v42 }
 0x1b6   :  { %v428_v23 = vmul.f32 %v554_v6, %v427_v12  ;;  %vm313_vm12 = vweird.f32 %v292_v11  ;;  %v320_v53 = vor.u32 1.1754944e-38, %v319_v46  ;;  %vm450_vm14 = vcmp.eq.f32.partialorder %v449_v47, 8.507059e+37 }
 0x1b7   :  { %v296_v26 = vmul.f32 %v556_v7, %v295_v22  ;;  %vm318_vm1 = vcmp.eq.f32.partialorder %v317_v49, 8.507059e+37 }
 0x1b8   :  { %v429_v28 = vadd.f32 %v554_v6, %v428_v23 }
 0x1b9   :  { %v558_v29 = vpop.eup %557  ;;  %v297_v31 = vadd.f32 %v556_v7, %v296_v26 }
 0x1ba   :  { %v560_v32 = vpop.eup %559  ;;  %v441_v34 = vmul.f32 %v558_v29, %v424_v9  ;;  %v433_v35 = vsel %vm432_vm5, %v554_v6, %v429_v28  ;;  %vm446_vm9 = vweird.f32 %v558_v29 }
 0x1bb   :  { %v309_v36 = vmul.f32 %v560_v32, %v292_v11  ;;  %v438_v37 = vsel %vm435_vm6, %v437_v30, %v433_v35  ;;  %v301_v38 = vsel %vm300_vm7, %v556_v7, %v297_v31  ;;  %vm314_vm10 = vweird.f32 %v560_v32  ;;  %vm447_vm13 = vmor %vm445_vm11, %vm446_vm9 }
 0x1bc   :  { %v442_v39 = vsub.f32 1.0, %v441_v34  ;;  %v439_v40 = vmul.f32 %v546_v57, %v438_v37  ;;  %v306_v41 = vsel %vm303_vm8, %v305_v33, %v301_v38  ;;  %vm315_vm15 = vmor %vm313_vm12, %vm314_vm10 }
 0x1bd   :  { %v310_v43 = vsub.f32 1.0, %v309_v36  ;;  %v307_v44 = vmul.f32 %v548_v59, %v306_v41 }
 0x1be   :  { %v443_v45 = vmul.f32 %v558_v29, %v442_v39  ;;  %459 = vperm.xlu1 %543, %v439_v40  }
 0x1bf   :  { %v311_v48 = vmul.f32 %v560_v32, %v310_v43  ;;  %327 = vperm.xlu2 %541, %v307_v44  }
 0x1c0   :  { %v444_v50 = vadd.f32 %v558_v29, %v443_v45 }
 0x1c1   :  { %v312_v52 = vadd.f32 %v560_v32, %v311_v48 }
 0x1c2   :  { %v448_v54 = vsel %vm447_vm13, %v558_v29, %v444_v50 }
 0x1c3   :  { %v453_v55 = vsel %vm450_vm14, %v452_v51, %v448_v54  ;;  %v316_v56 = vsel %vm315_vm15, %v560_v32, %v312_v52 }
 0x1c4   :  { %v321_v57 = vsel %vm318_vm1, %v320_v53, %v316_v56  ;;  %v454_v58 = vmul.f32 %v974_v63, %v453_v55 }
 0x1c5   :  { %v322_v59 = vmul.f32 %v976_v0, %v321_v57  ;;  %v455_v0 = vsub.f32 %v931_v13, %v945_v18 }
 0x1c7   :  { %464 = vperm.xlu2 %541, %v454_v58   ;;  %332 = vperm.xlu0 %542, %v322_v59  }
 0x219   :  { %v328_v61 = vpop.permute.xlu2 %327 }
 0x21a   :  { %v335_v62 = vmul.f32 %v328_v61, %v323_v60 }
 0x21c   :  { %v337_v1 = vadd.f32 %v335_v62, %v937_v15 }
 0x21e   :  { %339 = vst.msk [vmem:[#allocation16] sm:$0xff] %vm179_vm0, %v337_v1 }
 0x221   :  { %v465_v3 = vpop.permute.xlu2 %464 }
 0x222   :  { %v468_v4 = vmul.f32 %v465_v3, %v456_v2 }
 0x224   :  { %v470_v63 = vadd.f32 %v468_v4, %v959_v21 }
 0x226   :  { %472 = vst.msk [vmem:[#allocation17 + $0x8] sm:$0xff] %vm179_vm0, %v470_v63 }
 0x230   :  { %v460_v5 = vpop.permute.xlu1 %459 }
 0x231   :  { %v467_v15 = vmul.f32 %v460_v5, %v455_v0 }
 0x233   :  { %v469_v16 = vadd.f32 %v467_v15, %v945_v18 }
 0x235   :  { %471 = vst.msk [vmem:[#allocation17] sm:$0xff] %vm179_vm0, %v469_v16 }
 0x236   :  { %498 = dma.vmem_to_hbm [thread:$0]  %s491_s29, 256, %s493_s5, [#allocation18], %s816_s21, %s816_s21, %s817_s22  }
 0x239   :  { %v333_v13 = vpop.permute.xlu0 %332 }
 0x23a   :  { %v336_v21 = vmul.f32 %v333_v13, %v324_v17 }
 0x23c   :  { %v338_v18 = vadd.f32 %v336_v21, %v953_v19 }
 0x23e   :  { %340 = vst.msk [vmem:[#allocation16 + $0x8] sm:$0xff] %vm179_vm0, %v338_v18 }
 0x23f   :  { %485 = dma.vmem_to_hbm [thread:$0]  %s478_s13, 256, %s480_s10, [#allocation4], %s816_s21, %s816_s21, %s817_s22  }
 0x240   :  { %811 = dma.done.wait [#allocation4], 256  }
 0x241   :  { %812 = vsyncadd [#allocation4], 4294967040 }
 0x242   :  { %813 = dma.done.wait [#allocation18], 256  }
 0x243   :  { %814 = vsyncadd [#allocation18], 4294967040 }
 0x244   :  { %507 = vsyncpa [#allocation3], 1 }
 0x245   :  { %508 = vsyncpa [#allocation6], 1 }
 0x246   :  { %509 = vsyncpa [#allocation9], 1 }
 0x247   :  { %510 = vsyncpa [#allocation12], 1 }
 0x248   :  { %511 = vsyncpa [#allocation15], 1 }
 0x249   :  { %512 = vsyncpa [#allocation4], 1 }
 0x24a   :  { %513 = vsyncpa [#allocation18], 1 }

</bundles_post_ra>
